<compile_context>
chip_gen: v5e
topology: v5e:2x2
jax: 0.10.0
libtpu: 0.0.40
codegen_flags: <defaults>
</compile_context>

<pallas_src>
import functools
import math

import jax
import jax.numpy as jnp
from jax import lax
from jax.experimental import pallas as pl
from jax.experimental.pallas import tpu as pltpu


_F32_TEMP_BYTES = 8  # ~two f32 temporaries per element (upcast + neg/select)


def _vmem_budget_bytes() -> int:
    """Usable VMEM budget with ~30% headroom; fallback fits every generation."""
    try:
        cap = int(pltpu.get_tpu_info().vmem_capacity_bytes)
    except Exception:
        cap = 64 << 20  # v7x physical per-TC VMEM (smallest current gen)
    return min(int(cap * 0.70), 96 << 20)


def _fused_per_elem_bytes(itemsize: int) -> int:
    # 2x double-buffered input + 2x double-buffered output + f32 temporaries.
    return 2 * itemsize + 2 * itemsize + _F32_TEMP_BYTES


# ----------------------------------------------------------------------------
# Fused path: single HBM pass, whole matrices packed along the batch dim.
# ----------------------------------------------------------------------------
def _fused_kernel(a_ref, o_ref):
    # a_ref / o_ref: (TB, N, N) — TB whole adjacency matrices per grid step.
    a = a_ref[...].astype(jnp.float32)                    # (TB, N, N)
    n = a.shape[-1]

    r = lax.rsqrt(jnp.sum(a, axis=2, keepdims=True))      # (TB, N, 1) rsqrt(D_i)
    neg = a * (-r) * jnp.swapaxes(r, 1, 2)                 # -A_ij * r_i * r_j

    # "+1" only on the diagonal via a select — no materialised eye matrix.
    row = lax.broadcasted_iota(jnp.int32, (n, n), 0)
    col = lax.broadcasted_iota(jnp.int32, (n, n), 1)
    eq = (row == col)[None, :, :]
    o_ref[...] = jnp.where(eq, 1.0 + neg, neg).astype(o_ref.dtype)


def _laplacian_fused(adj, budget):
    b, n, _ = adj.shape
    itemsize = jnp.dtype(adj.dtype).itemsize
    per_elem = _fused_per_elem_bytes(itemsize)

    # Block sizing by BYTES (~4 MiB of input per step), clipped so the full
    # pipelined working set fits the VMEM budget, and capped at ceil(B/2) so
    # a v7x megacore always has >= 2 grid steps along the parallel axis.
    target_block_bytes = 4 << 20
    tb = max(1, target_block_bytes // (n * n * itemsize))
    tb = min(tb, max(1, budget // (per_elem * n * n)))
    tb = min(tb, b)
    if b >= 2:
        tb = min(tb, -(-b // 2))
    grid_b = pl.cdiv(b, tb)

    cost = pl.CostEstimate(
        flops=int(4 * b * n * n),
        transcendentals=int(b * n),
        bytes_accessed=int(2 * b * n * n * itemsize),
    )

    return pl.pallas_call(
        _fused_kernel,
        out_shape=jax.ShapeDtypeStruct((b, n, n), adj.dtype),
        grid_spec=pltpu.PrefetchScalarGridSpec(
            num_scalar_prefetch=0,
            grid=(grid_b,),
            in_specs=[pl.BlockSpec((tb, n, n), lambda i: (i, 0, 0))],
            out_specs=pl.BlockSpec((tb, n, n), lambda i: (i, 0, 0)),
        ),
        compiler_params=pltpu.CompilerParams(
            dimension_semantics=("parallel",),
            vmem_limit_bytes=int(budget),
        ),
        cost_estimate=cost,
    )(adj)


# ----------------------------------------------------------------------------
# Tiled path: very large N, rectangular (row, col) tiles, precomputed degrees.
# ----------------------------------------------------------------------------
def _tiled_kernel(a_ref, drow_ref, dcol_ref, o_ref, *, tm, tn):
    # a_ref: (1, TM, TN); drow_ref: (1, TM, 1); dcol_ref: (1, 1, TN).
    i = pl.program_id(1)      # row-tile index
    j = pl.program_id(2)      # col-tile index

    a = a_ref[...].astype(jnp.float32)
    neg = a * (-drow_ref[...]) * dcol_ref[...]            # -A_ij * r_i * r_j

    # Does this (row, col) tile rectangle intersect the global diagonal?
    intersects = jnp.logical_and(i * tm < (j + 1) * tn, j * tn < (i + 1) * tm)

    @pl.when(jnp.logical_not(intersects))
    def _():
        o_ref[...] = neg.astype(o_ref.dtype)

    @pl.when(intersects)
    def _():
        row_g = i * tm + lax.broadcasted_iota(jnp.int32, (1, tm, tn), 1)
        col_g = j * tn + lax.broadcasted_iota(jnp.int32, (1, tm, tn), 2)
        o_ref[...] = jnp.where(row_g == col_g, 1.0 + neg, neg).astype(o_ref.dtype)


def _laplacian_tiled(adj, tile_m, tile_n, budget):
    b, n, _ = adj.shape
    tm = min(tile_m, n)
    tn = min(tile_n, n)

    # Degree vector precomputed once (cheap XLA reduce) so the Pallas kernel
    # never needs a whole row resident — VMEM stays O(TM*TN) for any N.
    # Fed in both sublane (TM,1) and lane (1,TN) layouts (no in-kernel
    # transpose).
    r = lax.rsqrt(jnp.sum(adj.astype(jnp.float32), axis=2))   # (B, N)
    d_row = r[:, :, None]
    d_col = r[:, None, :]

    itemsize = jnp.dtype(adj.dtype).itemsize
    cost = pl.CostEstimate(
        flops=int(4 * b * n * n),
        transcendentals=int(b * n),
        bytes_accessed=int(2 * b * n * n * itemsize + 2 * b * n * 4),
    )

    kernel = functools.partial(_tiled_kernel, tm=tm, tn=tn)
    return pl.pallas_call(
        kernel,
        out_shape=jax.ShapeDtypeStruct((b, n, n), adj.dtype),
        grid_spec=pltpu.PrefetchScalarGridSpec(
            num_scalar_prefetch=0,
            grid=(b, pl.cdiv(n, tm), pl.cdiv(n, tn)),
            in_specs=[
                pl.BlockSpec((1, tm, tn), lambda bb, i, j: (bb, i, j)),
                pl.BlockSpec((1, tm, 1),  lambda bb, i, j: (bb, i, 0)),
                pl.BlockSpec((1, 1, tn),  lambda bb, i, j: (bb, 0, j)),
            ],
            out_specs=pl.BlockSpec((1, tm, tn), lambda bb, i, j: (bb, i, j)),
        ),
        compiler_params=pltpu.CompilerParams(
            dimension_semantics=("parallel", "parallel", "parallel"),
            vmem_limit_bytes=int(budget),
        ),
        cost_estimate=cost,
    )(adj, d_row, d_col)


# ----------------------------------------------------------------------------
# Tiny-N path: plain XLA (sub-128 lane width would waste the Pallas store path)
# ----------------------------------------------------------------------------
def _laplacian_small(adj):
    a32 = adj.astype(jnp.float32)
    r = lax.rsqrt(jnp.sum(a32, axis=2))
    scaled = a32 * r[:, :, None] * r[:, None, :]
    eye = jnp.eye(adj.shape[1], dtype=jnp.float32)
    return (eye[None] - scaled).astype(adj.dtype)


# ----------------------------------------------------------------------------
# Public wrapper
# ----------------------------------------------------------------------------
def get_laplacian(adj_matrix: jax.Array, *, fused_max_n: int | None = None,
                  tile_m: int = 256, tile_n: int = 1024) -> jax.Array:
    """Normalized graph Laplacian: L = I - D^{-1/2} A D^{-1/2}.

    adj_matrix: (B, N, N) float array.  Returns (B, N, N) in the input dtype.
    fused_max_n=None derives the single-pass cutoff from the VMEM budget.
    """
    b, n, n2 = adj_matrix.shape
    assert n == n2, "adjacency matrices must be square"
    if n < 128:
        return _laplacian_small(adj_matrix)

    budget = _vmem_budget_bytes()
    if fused_max_n is None:
        itemsize = jnp.dtype(adj_matrix.dtype).itemsize
        fused_max_n = int(math.isqrt(budget // _fused_per_elem_bytes(itemsize)))
    if n <= fused_max_n:
        return _laplacian_fused(adj_matrix, budget)
    return _laplacian_tiled(adj_matrix, tile_m, tile_n, budget)


# ----------------------------------------------------------------------------
# Pure-JAX reference mirroring the PyTorch forward (normalize=True branch).
# ----------------------------------------------------------------------------
def _reference_laplacian(adj_matrix: jnp.ndarray) -> jnp.ndarray:
    D = jnp.sum(adj_matrix, axis=2)                     # (B, N)
    eye = jax.vmap(jnp.diag)(jnp.ones_like(D))          # (B, N, N)
    Dm = jax.vmap(jnp.diag)(1.0 / jnp.sqrt(D))          # (B, N, N)
    L = eye - jnp.matmul(
        jnp.matmul(Dm, adj_matrix, precision=lax.Precision.HIGHEST),
        Dm, precision=lax.Precision.HIGHEST)
    return L


if __name__ == "__main__":
    key = jax.random.PRNGKey(0)
    k1, k2, k3 = jax.random.split(key, 3)

    # --- fused single-pass kernel (N >= 128, batch-packed, >=2 grid steps) --
    B, N = 4, 128
    a = jax.random.uniform(k1, (B, N, N), dtype=jnp.float32,
                           minval=0.1, maxval=1.0)
    adj = 0.5 * (a + jnp.swapaxes(a, 1, 2))             # positive degrees
    out = jax.block_until_ready(get_laplacian(adj))
    ref = _reference_laplacian(adj)
    assert out.shape == (B, N, N)
    assert jnp.allclose(out, ref, atol=1e-5, rtol=1e-4)

    # --- tiled rectangular-block path (forced, reduced tile sizes) ---------
    B2, N2 = 2, 512
    a2 = jax.random.uniform(k2, (B2, N2, N2), dtype=jnp.float32,
                            minval=0.1, maxval=1.0)
    adj2 = 0.5 * (a2 + jnp.swapaxes(a2, 1, 2))
    out2 = jax.block_until_ready(
        get_laplacian(adj2, fused_max_n=0, tile_m=128, tile_n=256))
    ref2 = _reference_laplacian(adj2)
    assert out2.shape == (B2, N2, N2)
    assert jnp.allclose(out2, ref2, atol=1e-5, rtol=1e-4)

    # --- tiny-N path (handled outside Pallas, lane width < 128) ------------
    B3, N3 = 2, 16
    a3 = jax.random.uniform(k3, (B3, N3, N3), dtype=jnp.float32,
                            minval=0.1, maxval=1.0)
    adj3 = 0.5 * (a3 + jnp.swapaxes(a3, 1, 2))
    out3 = jax.block_until_ready(get_laplacian(adj3))
    ref3 = _reference_laplacian(adj3)
    assert jnp.allclose(out3, ref3, atol=1e-5, rtol=1e-4)

    print("KERNEL_OK")
</pallas_src>

<mosaic_0001>
module attributes {stable_mosaic.version = 11 : i64} {
  func.func @_fused_kernel(%arg0: i32, %arg1: memref<2x128x128xf32, #tpu.memory_space<vmem>>, %arg2: memref<2x128x128xf32, #tpu.memory_space<vmem>>) attributes {dimension_semantics = [#tpu.dimension_semantics<parallel>], iteration_bounds = array<i64: 2>, scalar_prefetch = 0 : i64, scratch_operands = 0 : i64, tpu.core_type = #tpu.core_type<tc>, window_params = [{transform_indices = @transform_0, window_bounds = array<i64: 2, 128, 128>}, {transform_indices = @transform_1, window_bounds = array<i64: 2, 128, 128>}]} {
    %c0 = arith.constant 0 : index
    %c0_0 = arith.constant 0 : index
    %c0_1 = arith.constant 0 : index
    %0 = vector.load %arg1[%c0, %c0_0, %c0_1] : memref<2x128x128xf32, #tpu.memory_space<vmem>>, vector<2x128x128xf32>
    %cst = arith.constant dense<0.000000e+00> : vector<2x128xf32>
    %1 = vector.multi_reduction <add>, %0, %cst [2] : vector<2x128x128xf32> to vector<2x128xf32>
    %2 = vector.shape_cast %1 : vector<2x128xf32> to vector<2x128x1xf32>
    %3 = math.rsqrt %2 : vector<2x128x1xf32>
    %cst_2 = arith.constant 0.000000e+00 : f32
    %4 = vector.broadcast %cst_2 : f32 to vector<2x128x1xf32>
    %5 = arith.subf %4, %3 : vector<2x128x1xf32>
    %6 = vector.broadcast %5 : vector<2x128x1xf32> to vector<2x128x128xf32>
    %7 = arith.mulf %0, %6 : vector<2x128x128xf32>
    %8 = tpu.transpose %3, [0, 2, 1] : vector<2x128x1xf32> -> vector<2x1x128xf32>
    %9 = vector.broadcast %8 : vector<2x1x128xf32> to vector<2x128x128xf32>
    %10 = arith.mulf %7, %9 : vector<2x128x128xf32>
    %11 = tpu.iota {dimensions = array<i32: 0>} : vector<128x128xi32>
    %12 = tpu.iota {dimensions = array<i32: 1>} : vector<128x128xi32>
    %13 = arith.cmpi eq, %11, %12 : vector<128x128xi32>
    %14 = vector.shape_cast %13 : vector<128x128xi1> to vector<1x128x128xi1>
    %cst_3 = arith.constant 1.000000e+00 : f32
    %15 = vector.broadcast %cst_3 : f32 to vector<2x128x128xf32>
    %16 = arith.addf %15, %10 : vector<2x128x128xf32>
    %17 = vector.shape_cast %14 : vector<1x128x128xi1> to vector<1x128x128xi1>
    %18 = vector.broadcast %17 : vector<1x128x128xi1> to vector<2x128x128xi1>
    %19 = arith.select %18, %16, %10 : vector<2x128x128xi1>, vector<2x128x128xf32>
    %c0_4 = arith.constant 0 : index
    %c0_5 = arith.constant 0 : index
    %c0_6 = arith.constant 0 : index
    %20 = vector.load %arg2[%c0_4, %c0_5, %c0_6] : memref<2x128x128xf32, #tpu.memory_space<vmem>>, vector<2x128x128xf32>
    tpu.vector_store %arg2[%c0_4, %c0_5, %c0_6], %19 {strides = array<i32>} : memref<2x128x128xf32, #tpu.memory_space<vmem>>, vector<2x128x128xf32>,
    return
  }
  func.func @transform_0(%arg0: i32) -> (i32, i32, i32) {
    %c0_i32 = arith.constant 0 : i32
    %c0_i32_0 = arith.constant 0 : i32
    %c0_i32_1 = arith.constant 0 : i32
    return %arg0, %c0_i32, %c0_i32_0 : i32, i32, i32
  }
  func.func @transform_1(%arg0: i32) -> (i32, i32, i32) {
    %c0_i32 = arith.constant 0 : i32
    %c0_i32_0 = arith.constant 0 : i32
    %c0_i32_1 = arith.constant 0 : i32
    return %arg0, %c0_i32, %c0_i32_0 : i32, i32, i32
  }
}

</mosaic_0001>

<bundles_post_ra>
// kernel: tpu_custom_call.1
= control target key start
LH: loop header
LB: loop body
LE: loop exit
PB: predicated region body
PF: predicated region fallthrough
CT: control target
= control target key end

     0   :  { %6 = vsyncpa [#allocation3], 0  ;;  %s2155_s0 = inlined_call_operand.hbm [shape: f32[4,128,128], index: 0, kind: input, shape index: {}]   ;;  %s2156_s1 = inlined_call_operand.hbm [shape: f32[4,128,128], index: 1, kind: output, shape index: {}]  }
   0x1   :  { %8 = vsyncpa [#allocation3 + $0x1], 0 }
   0x2   :  { %9 = vsyncpa [#allocation4], 0 }
   0x3   :  { %11 = vsyncpa [#allocation4 + $0x1], 0  ;;  %s1233_s6 = smov 0   ;;  %s1235_s7 = smov 0  }
   0x4   :  { %s1237_s8 = smov 0   ;;  %s1239_s9 = smov 0  }
   0x5 LB: > { %s1254_s10 = sadd.s32 4294967295, %s1217_s9   ;;  %s971_s11 = sadd.s32 4294967294, %s1217_s9   ;;  %s1217_s9 = sphi %s1239_s9, %s2168_s9   ;;  %s1213_s8 = sphi %s1237_s8, %s2167_s8   ;;  %s1209_s7 = sphi %s1235_s7, %s2166_s7   ;;  %s1205_s6 = sphi %s1233_s6, %s2165_s6  }
   0x6   : > { %s1258_s12 = sadd.s32 1, %s1217_s9   ;;  %s24_s13 = sadd.s32 1, %s1213_s8 }
   0x7   : > { %s21_s14 = ssub.s32 %s1217_s9, %s1258_s12  ;;  %p31_p0 = scmp.ne.s32.totalorder %s1213_s8, %s1209_s7 }
   0x8   : > { %p22_p1 = scmp.eq.s32.totalorder %s21_s14, 0  ;;  %p32_p2 = scmp.eq.s32.totalorder %s1217_s9, 0 }
   0x9   : > { %p37_p3 = scmp.ne.s32.totalorder %s1209_s7, %s1205_s6  ;;  %p38_p4 = scmp.eq.s32.totalorder %s1254_s10, 0 }
   0xa   : > { %s1270_s15 = scalar_select %p22_p1, %s1213_s8, %s24_s13  }
   0xb   : > { %p1272_p5 = por %p32_p2, %p31_p0  ;;  %p1276_p6 = por %p38_p4, %p37_p3 }
   0xc   : > { %p61_p7 = scmp.eq.s32.totalorder %s1254_s10, 1  ;;  %p67_p8 = scmp.eq.s32.totalorder %s971_s11, 1 }
   0xd   : > { %p1003_p10 = scmp.lt.s32.totalorder %s1217_s9, 2  ;;  %s87_s20 = sand.u32 1, %s1213_s8  }
   0xe   : > { %p1283_p11 = por %p61_p7, %p31_p0  ;;  %p1287_p12 = por %p67_p8, %p37_p3 }
   0xf   : > { %s988_s21 = sshll.u32 %s1217_s9, 8  ;;  %s974_s22 = sshll.u32 %s87_s20, 8 }
  0x10   : > { %s97_s25 = scalar_lea.hbm %s2155_s0, %s988_s21  ;;  %s91_s27 = scalar_lea.vmem [#allocation2], %s974_s22 }
  0x11   : > { %s98_s26 = sshll.u32 %s97_s25, 4  ;;  %s100_s28 = sshll.u32 %s91_s27, 4  ;;  %s99_s26 = int_to_ptr.hbm [resolvable:$true] %s98_s26  ;;  %s101_s28 = int_to_ptr.vmem [resolvable:$true] %s100_s28 }
  0x12   : > { %p1298_p13 = pnand %p1003_p10, %p1272_p5  ;;  %p978_p0 = scmp.ge.s32.totalorder %s1217_s9, 1 }
  0x13   : > { %p108_p1 = scmp.lt.s32.totalorder %s1217_s9, 3  ;;  %s88_s30 = scalar_lea.sflag [#allocation3], %s87_s20 }
  0x14   : > { %s1121_s2 = sshra.s32 %s99_s26, 4  ;;  %p1125_p3 = pneg %p1298_p13  ;;  %s1122_s2 = int_to_ptr.hbm [resolvable:$true] %s1121_s2 }
  0x15   : > { %s1123_s3 = scalar_lea.hbm %s1122_s2, 256  ;;  %s1128_s11 = scalar_lea.hbm %s2155_s0, 512 }
  0x16   : > { %p1124_p2 = scmp.ne.s32.totalorder %s1122_s2, %s1123_s3  ;;  %p1129_p5 = scmp.lt.s32.totalorder %s1122_s2, %s2155_s0 }
  0x17   : > { %p1130_p8 = scmp.lt.s32.totalorder %s1128_s11, %s1123_s3 }
  0x18   : > { %p1126_p4 = pnand %p1125_p3, %p1124_p2 }
  0x19   : > { %p1131_p10 = por %p1130_p8, %p1129_p5 }
  0x1a   : > { %p1127_p7 = pneg %p1126_p4 }
  0x1c   : > { %p1132_p9 = pnand %p1131_p10, %p1127_p7 }
  0x1e   : > { %1135 = shalt.err (!%p1132_p9)
}
  0x1f   : > { %s1219_s16 = smov 128   ;;  %s1220_s20 = smov 8  }
  0x20   : > { %998 = dma.hbm_to_vmem [thread:$0]  (!%p1298_p13), %s99_s26, 4096, %s101_s28, %s88_s30, %s1219_s16, %s1219_s16, %s1220_s20  }
  0x21   : > { %p109_p2 = pnand %p978_p0, %p108_p1 }
  0x22   : > { %s1319_s21 = sand.u32 (!%p109_p2), 1, %s1209_s7  }
  0x23   : > { %112 = sbr.rel (%p109_p2) target bundleno = 408 (0x198), region = 24  ;;  %s979_s22 = sshll.u32 (!%p109_p2), %s1319_s21, 8 }
  0x24   : > { %s115_s23 = scalar_lea.sflag (!%p109_p2), [#allocation3], %s1319_s21  ;;  %s1325_s24 = scalar_lea.vmem (!%p109_p2), [#allocation2], %s979_s22 }
  0x28   : > { %1196 = dma.done.wait (%p1276_p6), %s115_s23, 4096  }
  0x29   : > { %1198 = vsyncadd (%p1276_p6), %s115_s23, 4294963200  ;;  %v1332_v0 = vld [vmem:[%s1325_s24 + $0x20] sm:$0xff]  ;;  %v1335_v1 = vld [vmem:[%s1325_s24 + $0x10] sm:$0xff]  ;;  %s1925_s17 = scalar_lea.vmem [#allocation5], %s979_s22  ;;  %s990_s25 = sshll.u32 %s1254_s10, 8 }
  0x2a   : > { %v1338_v2 = vld [vmem:[%s1325_s24] sm:$0xff]  ;;  %180 = vadd.xlane.f32.xlu2 %v1332_v0  ;;  %176 = vadd.xlane.f32.xlu1 %v1335_v1  ;;  %v1344_v3 = vld [vmem:[%s1325_s24 + $0x28] sm:$0xff]  ;;  %v1347_v4 = vld [vmem:[%s1325_s24 + $0x18] sm:$0xff]  ;;  %s894_s27 = scalar_lea.hbm %s2156_s1, %s990_s25  ;;  %s895_s28 = sshll.u32 %s1925_s17, 4  ;;  %s896_s28 = int_to_ptr.vmem [resolvable:$true] %s895_s28 }
  0x2b   : > { %172 = vadd.xlane.f32.xlu0 %v1338_v2  ;;  %v1350_v5 = vld [vmem:[%s1325_s24 + $0x8] sm:$0xff]  ;;  %v1356_v6 = vld [vmem:[%s1325_s24 + $0x40] sm:$0xff]  ;;  %v1359_v7 = vld [vmem:[%s1325_s24 + $0x38] sm:$0xff]  ;;  %s897_s29 = sshll.u32 %s894_s27, 4  ;;  %s882_s30 = scalar_lea.sflag [#allocation4], %s1319_s21  ;;  %s898_s29 = int_to_ptr.hbm [resolvable:$true] %s897_s29 }
  0x2c   : > { %v1362_v8 = vld [vmem:[%s1325_s24 + $0x30] sm:$0xff]  ;;  %v1368_v9 = vld [vmem:[%s1325_s24 + $0x58] sm:$0xff]  ;;  %v1374_v11 = vld [vmem:[%s1325_s24 + $0x48] sm:$0xff]  ;;  %s1165_s2 = sshra.s32 %s898_s29, 4  ;;  %s1171_s11 = scalar_lea.hbm %s2156_s1, 512  ;;  %s1166_s2 = int_to_ptr.hbm [resolvable:$true] %s1165_s2 }
  0x2d   : > { %v1371_v10 = vld [vmem:[%s1325_s24 + $0x50] sm:$0xff]  ;;  %v1383_v13 = vld [vmem:[%s1325_s24 + $0x68] sm:$0xff]  ;;  %v1386_v14 = vld [vmem:[%s1325_s24 + $0x60] sm:$0xff]  ;;  %s1167_s3 = scalar_lea.hbm %s1166_s2, 256  ;;  %p1172_p0 = scmp.lt.s32.totalorder %s1166_s2, %s2156_s1 }
  0x2e   : > { %v1380_v12 = vld [vmem:[%s1325_s24 + $0x70] sm:$0xff]  ;;  %v157_v15 = vld [vmem:[%s1325_s24 + $0x88] sm:$0xff]  ;;  %v156_v16 = vld [vmem:[%s1325_s24 + $0x80] sm:$0xff]  ;;  %p1168_p6 = scmp.ne.s32.totalorder %s1166_s2, %s1167_s3  ;;  %p1173_p1 = scmp.lt.s32.totalorder %s1171_s11, %s1167_s3 }
  0x2f   : > { %v1394_v17 = vld [vmem:[%s1325_s24 + $0x78] sm:$0xff]  ;;  %v160_v19 = vld [vmem:[%s1325_s24 + $0xa0] sm:$0xff]  ;;  %v158_v20 = vld [vmem:[%s1325_s24 + $0x90] sm:$0xff] }
  0x30   : > { %v159_v18 = vld [vmem:[%s1325_s24 + $0x98] sm:$0xff]  ;;  %v162_v21 = vld [vmem:[%s1325_s24 + $0xb0] sm:$0xff]  ;;  %v161_v23 = vld [vmem:[%s1325_s24 + $0xa8] sm:$0xff]  ;;  %p1169_p9 = pnand %p1168_p6, %p1283_p11  ;;  %p1174_p3 = por %p1173_p1, %p1172_p0 }
  0x31   : > { %v163_v22 = vld [vmem:[%s1325_s24 + $0xb8] sm:$0xff]  ;;  %v166_v24 = vld [vmem:[%s1325_s24 + $0xd0] sm:$0xff]  ;;  %v165_v25 = vld [vmem:[%s1325_s24 + $0xc8] sm:$0xff] }
  0x32   : > { %182 = vadd.xlane.f32.xlu2 %v1344_v3  ;;  %178 = vadd.xlane.f32.xlu1 %v1347_v4  ;;  %v164_v26 = vld [vmem:[%s1325_s24 + $0xc0] sm:$0xff]  ;;  %v169_v27 = vld [vmem:[%s1325_s24 + $0xe8] sm:$0xff]  ;;  %v167_v28 = vld [vmem:[%s1325_s24 + $0xd8] sm:$0xff]  ;;  %p1170_p13 = pneg %p1169_p9 }
  0x33   : > { %174 = vadd.xlane.f32.xlu0 %v1350_v5  ;;  %v170_v29 = vld [vmem:[%s1325_s24 + $0xf0] sm:$0xff]  ;;  %v168_v30 = vld [vmem:[%s1325_s24 + $0xe0] sm:$0xff]  ;;  %v171_v33 = vld [vmem:[%s1325_s24 + $0xf8] sm:$0xff] }
  0x34   : > { %p1175_p4 = pnand %p1174_p3, %p1170_p13 }
  0x3a   : > { %188 = vadd.xlane.f32.xlu2 %v1356_v6  ;;  %186 = vadd.xlane.f32.xlu1 %v1359_v7 }
  0x3b   : > { %184 = vadd.xlane.f32.xlu0 %v1362_v8 }
  0x42   : > { %194 = vadd.xlane.f32.xlu2 %v1368_v9  ;;  %192 = vadd.xlane.f32.xlu1 %v1371_v10 }
  0x43   : > { %190 = vadd.xlane.f32.xlu0 %v1374_v11 }
  0x4a   : > { %200 = vadd.xlane.f32.xlu2 %v1380_v12  ;;  %198 = vadd.xlane.f32.xlu1 %v1383_v13 }
  0x4b   : > { %196 = vadd.xlane.f32.xlu0 %v1386_v14 }
  0x52   : > { %206 = vadd.xlane.f32.xlu2 %v157_v15  ;;  %204 = vadd.xlane.f32.xlu1 %v156_v16 }
  0x53   : > { %202 = vadd.xlane.f32.xlu0 %v1394_v17 }
  0x5a   : > { %210 = vadd.xlane.f32.xlu1 %v159_v18  ;;  %212 = vadd.xlane.f32.xlu2 %v160_v19 }
  0x5b   : > { %208 = vadd.xlane.f32.xlu0 %v158_v20 }
  0x62   : > { %216 = vadd.xlane.f32.xlu1 %v162_v21  ;;  %218 = vadd.xlane.f32.xlu2 %v163_v22 }
  0x63   : > { %214 = vadd.xlane.f32.xlu0 %v161_v23 }
  0x6a   : > { %224 = vadd.xlane.f32.xlu2 %v166_v24  ;;  %222 = vadd.xlane.f32.xlu1 %v165_v25 }
  0x6b   : > { %220 = vadd.xlane.f32.xlu0 %v164_v26 }
  0x72   : > { %230 = vadd.xlane.f32.xlu2 %v169_v27  ;;  %228 = vadd.xlane.f32.xlu1 %v168_v30 }
  0x73   : > { %226 = vadd.xlane.f32.xlu0 %v167_v28 }
  0x7a   : > { %234 = vadd.xlane.f32.xlu1 %v171_v33 }
  0x7b   : > { %232 = vadd.xlane.f32.xlu0 %v170_v29 }
  0x9d   : > { %v1410_v31 = vpop.xlane.xlu2 %180  ;;  %v177_v32 = vpop.xlane.xlu1 %176 }
  0x9e   : > { %v173_v34 = vpop.xlane.xlu0 %172  ;;  %vm262_vm7 = vweird.f32 %v177_v32  ;;  %vm282_vm12 = vweird.f32 %v1410_v31 }
  0x9f   : > { %1041 = vrsqrt.f32 %v173_v34  ;;  %vm242_vm0 = vweird.f32 %v173_v34 }
  0xa0   : > { %1043 = vrsqrt.f32 %v177_v32 }
  0xa5   : > { %v1413_v35 = vpop.xlane.xlu2 %182  ;;  %v1415_v36 = vpop.xlane.xlu1 %178 }
  0xa6   : > { %v1042_v37 = vpop.eup %1041  ;;  %v175_v38 = vpop.xlane.xlu0 %174  ;;  %vm272_vm10 = vweird.f32 %v1415_v36 }
  0xa7   : > { %v237_v39 = vmul.f32 %v1042_v37, %v173_v34  ;;  %1045 = vrsqrt.f32 %v175_v38  ;;  %v1044_v41 = vpop.eup %1043  ;;  %vm243_vm1 = vweird.f32 %v1042_v37  ;;  %vm252_vm3 = vweird.f32 %v175_v38 }
  0xa8   : > { %1047 = vrsqrt.f32 %v1415_v36  ;;  %v257_v47 = vmul.f32 %v1044_v41, %v177_v32  ;;  %vm244_vm2 = vmor %vm242_vm0, %vm243_vm1  ;;  %vm263_vm6 = vweird.f32 %v1044_v41  ;;  %vm292_vm0 = vweird.f32 %v1413_v35 }
  0xa9   : > { %v238_v40 = vmul.f32 %v1042_v37, %v237_v39  ;;  %1049 = vrsqrt.f32 %v1410_v31  ;;  %vm264_vm8 = vmor %vm262_vm7, %vm263_vm6 }
  0xaa   : > { %v258_v52 = vmul.f32 %v1044_v41, %v257_v47  ;;  %1051 = vrsqrt.f32 %v1413_v35 }
  0xab   : > { %v239_v42 = vmul.f32 0.5, %v238_v40 }
  0xac   : > { %v259_v59 = vmul.f32 0.5, %v258_v52 }
  0xad   : > { %v240_v43 = vsub.f32 1.5, %v239_v42  ;;  %v1418_v44 = vpop.xlane.xlu2 %188  ;;  %v1420_v45 = vpop.xlane.xlu1 %186 }
  0xae   : > { %v1046_v46 = vpop.eup %1045  ;;  %v1422_v48 = vpop.xlane.xlu0 %184  ;;  %v260_v63 = vsub.f32 1.5, %v259_v59 }
  0xaf   : > { %v247_v49 = vmul.f32 %v1046_v46, %v175_v38  ;;  %v241_v50 = vmul.f32 %v1042_v37, %v240_v43  ;;  %v1048_v54 = vpop.eup %1047  ;;  %vm253_vm4 = vweird.f32 %v1046_v46  ;;  %1053 = vrsqrt.f32 %v1422_v48 }
  0xb0   : > { %v267_v60 = vmul.f32 %v1048_v54, %v1415_v36  ;;  %vm254_vm5 = vmor %vm252_vm3, %vm253_vm4  ;;  %v1050_v18 = vpop.eup %1049  ;;  %v261_v24 = vmul.f32 %v1044_v41, %v260_v63  ;;  %vm273_vm9 = vweird.f32 %v1048_v54  ;;  %vm302_vm7 = vweird.f32 %v1422_v48 }
  0xb1   : > { %v248_v51 = vmul.f32 %v1046_v46, %v247_v49  ;;  %v1424_v53 = vsel %vm244_vm2, %v1042_v37, %v241_v50  ;;  %v277_v21 = vmul.f32 %v1050_v18, %v1410_v31  ;;  %v1446_v25 = vpop.eup %1051  ;;  %vm274_vm11 = vmor %vm272_vm10, %vm273_vm9  ;;  %vm283_vm13 = vweird.f32 %v1050_v18 }
  0xb2   : > { %620 = vxpose.xlu2.b32.start [1/16] (narrow) %v1424_v53, 8  ;;  %v268_v15 = vmul.f32 %v1048_v54, %v267_v60  ;;  %v1448_v28 = vsel %vm264_vm8, %v1044_v41, %v261_v24  ;;  %v287_v29 = vmul.f32 %v1446_v25, %v1413_v35  ;;  %vm284_vm14 = vmor %vm282_vm12, %vm283_vm13  ;;  %vm293_vm1 = vweird.f32 %v1446_v25 }
  0xb3   : > { %v249_v55 = vmul.f32 0.5, %v248_v51  ;;  %v278_v26 = vmul.f32 %v1050_v18, %v277_v21  ;;  %vm294_vm4 = vmor %vm292_vm0, %vm293_vm1 }
  0xb4   : > { %v269_v22 = vmul.f32 0.5, %v268_v15  ;;  %v288_v38 = vmul.f32 %v1446_v25, %v287_v29 }
  0xb5   : > { %v250_v56 = vsub.f32 1.5, %v249_v55  ;;  %v1428_v57 = vpop.xlane.xlu2 %194  ;;  %v1430_v58 = vpop.xlane.xlu1 %192  ;;  %v279_v34 = vmul.f32 0.5, %v278_v26 }
  0xb6   : > { %v1433_v61 = vpop.xlane.xlu0 %190  ;;  %v270_v27 = vsub.f32 1.5, %v269_v22  ;;  %v1463_v41 = vpop.eup %1053 }
  0xb7   : > { %v251_v62 = vmul.f32 %v1046_v46, %v250_v56  ;;  %v280_v39 = vsub.f32 1.5, %v279_v34  ;;  %v297_v47 = vmul.f32 %v1463_v41, %v1422_v48  ;;  %vm303_vm8 = vweird.f32 %v1463_v41 }
  0xb8   : > { %v271_v37 = vmul.f32 %v1048_v54, %v270_v27  ;;  %vm304_vm10 = vmor %vm302_vm7, %vm303_vm8 }
  0xb9   : > { %v1435_v16 = vsel %vm254_vm5, %v1046_v46, %v251_v62  ;;  %v289_v46 = vmul.f32 0.5, %v288_v38  ;;  %v281_v51 = vmul.f32 %v1050_v18, %v280_v39  ;;  %v298_v59 = vmul.f32 %v1463_v41, %v297_v47 }
  0xba   : > { %621 = vxpose.xlu2.b32.cont [2/16] (narrow) %v1435_v16, 8  ;;  %v1461_v40 = vsel %vm274_vm11, %v1048_v54, %v271_v37 }
  0xbb   : > { %v290_v31 = vsub.f32 1.5, %v289_v46  ;;  %v1483_v62 = vsel %vm284_vm14, %v1050_v18, %v281_v51  ;;  %v299_v18 = vmul.f32 0.5, %v298_v59 }
  0xbd   : > { %v1439_v19 = vpop.xlane.xlu2 %200  ;;  %v1441_v20 = vpop.xlane.xlu1 %198  ;;  %v291_v24 = vmul.f32 %v1446_v25, %v290_v31 }
  0xbe   : > { %v1444_v23 = vpop.xlane.xlu0 %196 }
  0xbf   : > { %v1511_v47 = vsel %vm294_vm4, %v1446_v25, %v291_v24  ;;  %vm322_vm4 = vweird.f32 %v1418_v44 }
  0xc2   : > { %622 = vxpose.xlu2.b32.cont [3/16] (narrow) %v1448_v28, 8 }
  0xc5   : > { %v1454_v30 = vpop.xlane.xlu2 %206  ;;  %v205_v33 = vpop.xlane.xlu1 %204 }
  0xc6   : > { %1055 = vrsqrt.f32 %v1454_v30  ;;  %v1457_v32 = vpop.xlane.xlu0 %202  ;;  %vm402_vm2 = vweird.f32 %v205_v33  ;;  %vm412_vm5 = vweird.f32 %v1454_v30 }
  0xc7   : > { %1057 = vrsqrt.f32 %v205_v33 }
  0xc8   : > { %1059 = vrsqrt.f32 %v1420_v45 }
  0xca   : > { %623 = vxpose.xlu2.b32.cont [4/16] (narrow) %v1461_v40, 8 }
  0xcc   : > { %v1466_v42 = vpop.eup %1055 }
  0xcd   : > { %v1058_v43 = vpop.eup %1057  ;;  %v407_v36 = vmul.f32 %v1466_v42, %v1454_v30  ;;  %v1478_v55 = vpop.xlane.xlu1 %210  ;;  %vm413_vm6 = vweird.f32 %v1466_v42 }
  0xce   : > { %v397_v49 = vmul.f32 %v1058_v43, %v205_v33  ;;  %v1474_v50 = vpop.xlane.xlu0 %208  ;;  %v1480_v56 = vpop.eup %1059  ;;  %vm403_vm15 = vweird.f32 %v1058_v43  ;;  %vm414_vm9 = vmor %vm412_vm5, %vm413_vm6  ;;  %vm432_vm1 = vweird.f32 %v1478_v55 }
  0xcf   : > { %1061 = vrsqrt.f32 %v1474_v50  ;;  %v408_v52 = vmul.f32 %v1466_v42, %v407_v36  ;;  %v307_v22 = vmul.f32 %v1480_v56, %v1420_v45  ;;  %vm404_vm3 = vmor %vm402_vm2, %vm403_vm15  ;;  %v1498_v37 = vpop.xlane.xlu2 %212  ;;  %v300_v36 = vsub.f32 1.5, %v299_v18 }
  0xd0   : > { %v398_v54 = vmul.f32 %v1058_v43, %v397_v49  ;;  %1063 = vrsqrt.f32 %v1478_v55  ;;  %vm422_vm11 = vweird.f32 %v1474_v50  ;;  %vm313_vm13 = vweird.f32 %v1480_v56 }
  0xd1   : > { %1065 = vrsqrt.f32 %v1418_v44  ;;  %v409_v63 = vmul.f32 0.5, %v408_v52  ;;  %v308_v46 = vmul.f32 %v1480_v56, %v307_v22  ;;  %v301_v30 = vmul.f32 %v1463_v41, %v300_v36 }
  0xd2   : > { %v399_v60 = vmul.f32 0.5, %v398_v54  ;;  %624 = vxpose.xlu2.b32.cont [5/16] (narrow) %v1483_v62, 8  ;;  %1067 = vrsqrt.f32 %v1498_v37  ;;  %vm312_vm15 = vweird.f32 %v1420_v45  ;;  %vm442_vm7 = vweird.f32 %v1498_v37 }
  0xd3   : > { %v410_v29 = vsub.f32 1.5, %v409_v63  ;;  %1069 = vrsqrt.f32 %v1433_v61  ;;  %v309_v25 = vmul.f32 0.5, %v308_v46  ;;  %vm314_vm0 = vmor %vm312_vm15, %vm313_vm13 }
  0xd4   : > { %v400_v15 = vsub.f32 1.5, %v399_v60  ;;  %1071 = vrsqrt.f32 %v1430_v58 }
  0xd5   : > { %v1488_v21 = vpop.eup %1061  ;;  %v411_v35 = vmul.f32 %v1466_v42, %v410_v29  ;;  %v310_v48 = vsub.f32 1.5, %v309_v25  ;;  %v1557_v46 = vpop.xlane.xlu1 %216 }
  0xd6   : > { %v417_v26 = vmul.f32 %v1488_v21, %v1474_v50  ;;  %v401_v27 = vmul.f32 %v1058_v43, %v400_v15  ;;  %v1502_v39 = vpop.eup %1063  ;;  %v1527_v31 = vpop.xlane.xlu0 %214  ;;  %v1538_v15 = vsel %vm304_vm10, %v1463_v41, %v301_v30  ;;  %vm423_vm12 = vweird.f32 %v1488_v21 }
  0xd7   : > { %v1507_v33 = vpop.eup %1065  ;;  %v427_v49 = vmul.f32 %v1502_v39, %v1478_v55  ;;  %v1530_v59 = vsel %vm414_vm9, %v1466_v42, %v411_v35  ;;  %1073 = vrsqrt.f32 %v1527_v31  ;;  %vm424_vm14 = vmor %vm422_vm11, %vm423_vm12  ;;  %vm433_vm2 = vweird.f32 %v1502_v39 }
  0xd8   : > { %v418_v34 = vmul.f32 %v1488_v21, %v417_v26  ;;  %v1500_v38 = vsel %vm404_vm3, %v1058_v43, %v401_v27  ;;  %v317_v51 = vmul.f32 %v1507_v33, %v1418_v44  ;;  %v1532_v60 = vpop.eup %1067  ;;  %v311_v27 = vmul.f32 %v1480_v56, %v310_v48  ;;  %vm434_vm3 = vmor %vm432_vm1, %vm433_vm2 }
  0xd9   : > { %652 = vxpose.xlu0.b32.start [1/16] (narrow) %v1500_v38, 8  ;;  %v428_v54 = vmul.f32 %v1502_v39, %v427_v49  ;;  %v1540_v22 = vpop.eup %1069  ;;  %v437_v24 = vmul.f32 %v1532_v60, %v1498_v37  ;;  %1075 = vrsqrt.f32 %v1557_v46  ;;  %vm323_vm5 = vweird.f32 %v1507_v33 }
  0xda   : > { %625 = vxpose.xlu2.b32.cont [6/16] (narrow) %v1511_v47, 8  ;;  %v419_v43 = vmul.f32 0.5, %v418_v34  ;;  %v318_v63 = vmul.f32 %v1507_v33, %v317_v51  ;;  %v327_v41 = vmul.f32 %v1540_v22, %v1433_v61  ;;  %v1553_v50 = vpop.eup %1071  ;;  %v1568_v45 = vsel %vm314_vm0, %v1480_v56, %v311_v27  ;;  %vm324_vm6 = vmor %vm322_vm4, %vm323_vm5 }
  0xdb   : > { %v429_v42 = vmul.f32 0.5, %v428_v54  ;;  %v438_v34 = vmul.f32 %v1532_v60, %v437_v24  ;;  %1077 = vrsqrt.f32 %v1428_v57  ;;  %v337_v55 = vmul.f32 %v1553_v50, %v1430_v58 }
  0xdc   : > { %v420_v52 = vsub.f32 1.5, %v419_v43  ;;  %v319_v26 = vmul.f32 0.5, %v318_v63  ;;  %v328_v35 = vmul.f32 %v1540_v22, %v327_v41  ;;  %v1583_v63 = vpop.xlane.xlu2 %218  ;;  %vm443_vm8 = vweird.f32 %v1532_v60 }
  0xdd   : > { %v430_v29 = vsub.f32 1.5, %v429_v42  ;;  %v1562_v43 = vpop.eup %1073  ;;  %v338_v24 = vmul.f32 %v1553_v50, %v337_v55  ;;  %1079 = vrsqrt.f32 %v1583_v63  ;;  %vm444_vm9 = vmor %vm442_vm7, %vm443_vm8  ;;  %vm332_vm10 = vweird.f32 %v1433_v61 }
  0xde   : > { %v421_v18 = vmul.f32 %v1488_v21, %v420_v52  ;;  %v320_v49 = vsub.f32 1.5, %v319_v26  ;;  %v447_v51 = vmul.f32 %v1562_v43, %v1527_v31  ;;  %v329_v56 = vmul.f32 0.5, %v328_v35  ;;  %v1611_v35 = vpop.xlane.xlu0 %220 }
  0xdf   : > { %v431_v25 = vmul.f32 %v1502_v39, %v430_v29  ;;  %v1588_v42 = vpop.eup %1075  ;;  %1081 = vrsqrt.f32 %v1444_v23  ;;  %v339_v37 = vmul.f32 0.5, %v338_v24  ;;  %vm333_vm11 = vweird.f32 %v1540_v22 }
  0xe0   : > { %v1560_v36 = vsel %vm424_vm14, %v1488_v21, %v421_v18  ;;  %v439_v21 = vmul.f32 0.5, %v438_v34  ;;  %v321_v30 = vmul.f32 %v1507_v33, %v320_v49  ;;  %v448_v54 = vmul.f32 %v1562_v43, %v447_v51  ;;  %vm334_vm12 = vmor %vm332_vm10, %vm333_vm11 }
  0xe1   : > { %653 = vxpose.xlu0.b32.cont [2/16] (narrow) %v1530_v59, 8  ;;  %v1586_v48 = vsel %vm434_vm3, %v1502_v39, %v431_v25  ;;  %v1592_v44 = vpop.eup %1077  ;;  %v330_v18 = vsub.f32 1.5, %v329_v56  ;;  %v457_v41 = vmul.f32 %v1588_v42, %v1557_v46  ;;  %v340_v61 = vsub.f32 1.5, %v339_v37 }
  0xe2   : > { %626 = vxpose.xlu2.b32.cont [7/16] (narrow) %v1538_v15, 8  ;;  %v440_v52 = vsub.f32 1.5, %v439_v21  ;;  %v1596_v26 = vsel %vm324_vm6, %v1507_v33, %v321_v30  ;;  %v449_v39 = vmul.f32 0.5, %v448_v54  ;;  %v347_v29 = vmul.f32 %v1592_v44, %v1428_v57 }
  0xe3   : > { %v331_v33 = vmul.f32 %v1540_v22, %v330_v18  ;;  %v458_v49 = vmul.f32 %v1588_v42, %v457_v41  ;;  %v1616_v51 = vpop.eup %1079  ;;  %vm452_vm13 = vweird.f32 %v1527_v31  ;;  %vm453_vm14 = vweird.f32 %v1562_v43 }
  0xe4   : > { %v441_v27 = vmul.f32 %v1532_v60, %v440_v52  ;;  %v450_v34 = vsub.f32 1.5, %v449_v39  ;;  %v348_v25 = vmul.f32 %v1592_v44, %v347_v29  ;;  %1083 = vrsqrt.f32 %v1611_v35  ;;  %vm454_vm15 = vmor %vm452_vm13, %vm453_vm14  ;;  %v1639_v39 = vpop.xlane.xlu1 %222 }
  0xe5   : > { %v1622_v55 = vsel %vm334_vm12, %v1540_v22, %v331_v33  ;;  %v1625_v56 = vpop.eup %1081  ;;  %1085 = vrsqrt.f32 %v1441_v20  ;;  %v467_v30 = vmul.f32 %v1616_v51, %v1583_v63  ;;  %v341_v54 = vmul.f32 %v1553_v50, %v340_v61 }
  0xe6   : > { %v1614_v21 = vsel %vm444_vm9, %v1532_v60, %v441_v27  ;;  %v459_v60 = vmul.f32 0.5, %v458_v49  ;;  %v451_v52 = vmul.f32 %v1562_v43, %v450_v34  ;;  %v349_v31 = vmul.f32 0.5, %v348_v25 }
  0xe7   : > { %v357_v22 = vmul.f32 %v1625_v56, %v1444_v23  ;;  %vm343_vm0 = vweird.f32 %v1553_v50  ;;  %vm342_vm1 = vweird.f32 %v1430_v58  ;;  %v468_v18 = vmul.f32 %v1616_v51, %v467_v30  ;;  %v1667_v30 = vpop.xlane.xlu2 %224 }
  0xe8   : > { %v460_v24 = vsub.f32 1.5, %v459_v60  ;;  %v1642_v41 = vsel %vm454_vm15, %v1562_v43, %v451_v52  ;;  %v350_v29 = vsub.f32 1.5, %v349_v31  ;;  %vm344_vm2 = vmor %vm342_vm1, %vm343_vm0  ;;  %vm462_vm3 = vweird.f32 %v1557_v46 }
  0xe9   : > { %654 = vxpose.xlu0.b32.cont [3/16] (narrow) %v1560_v36, 8  ;;  %v358_v33 = vmul.f32 %v1625_v56, %v357_v22  ;;  %v1652_v58 = vsel %vm344_vm2, %v1553_v50, %v341_v54  ;;  %vm463_vm4 = vweird.f32 %v1588_v42  ;;  %1087 = vrsqrt.f32 %v1639_v39 }
  0xea   : > { %627 = vxpose.xlu2.b32.cont [8/16] (narrow) %v1568_v45, 8  ;;  %v1644_v27 = vpop.eup %1083  ;;  %1089 = vrsqrt.f32 %v1439_v19  ;;  %v469_v43 = vmul.f32 0.5, %v468_v18  ;;  %v461_v49 = vmul.f32 %v1588_v42, %v460_v24  ;;  %vm464_vm5 = vmor %vm462_vm3, %vm463_vm4  ;;  %vm352_vm6 = vweird.f32 %v1428_v57 }
  0xeb   : > { %v1647_v37 = vpop.eup %1085  ;;  %v477_v34 = vmul.f32 %v1644_v27, %v1611_v35  ;;  %v359_v50 = vmul.f32 0.5, %v358_v33  ;;  %v351_v25 = vmul.f32 %v1592_v44, %v350_v29  ;;  %vm353_vm7 = vweird.f32 %v1592_v44 }
  0xec   : > { %v367_v46 = vmul.f32 %v1647_v37, %v1441_v20  ;;  %v470_v61 = vsub.f32 1.5, %v469_v43  ;;  %v1670_v52 = vsel %vm464_vm5, %v1588_v42, %v461_v49  ;;  %vm354_vm8 = vmor %vm352_vm6, %vm353_vm7  ;;  %vm472_vm9 = vweird.f32 %v1583_v63  ;;  %v1695_v49 = vpop.xlane.xlu0 %226 }
  0xed   : > { %v478_v60 = vmul.f32 %v1644_v27, %v477_v34  ;;  %v360_v54 = vsub.f32 1.5, %v359_v50  ;;  %v1680_v24 = vsel %vm354_vm8, %v1592_v44, %v351_v25  ;;  %vm473_vm10 = vweird.f32 %v1616_v51 }
  0xee   : > { %v368_v22 = vmul.f32 %v1647_v37, %v367_v46  ;;  %1091 = vrsqrt.f32 %v1667_v30  ;;  %v471_v29 = vmul.f32 %v1616_v51, %v470_v61  ;;  %vm474_vm11 = vmor %vm472_vm9, %vm473_vm10  ;;  %vm362_vm12 = vweird.f32 %v1444_v23 }
  0xef   : > { %v1672_v31 = vpop.eup %1087  ;;  %v479_v42 = vmul.f32 0.5, %v478_v60  ;;  %1093 = vrsqrt.f32 %v1457_v32  ;;  %v361_v44 = vmul.f32 %v1625_v56, %v360_v54  ;;  %vm363_vm13 = vweird.f32 %v1625_v56 }
  0xf0   : > { %v1676_v57 = vpop.eup %1089  ;;  %v487_v18 = vmul.f32 %v1672_v31, %v1639_v39  ;;  %v369_v63 = vmul.f32 0.5, %v368_v22  ;;  %v1698_v46 = vsel %vm474_vm11, %v1616_v51, %v471_v29  ;;  %vm364_vm14 = vmor %vm362_vm12, %vm363_vm13  ;;  %vm482_vm15 = vweird.f32 %v1611_v35 }
  0xf1   : > { %655 = vxpose.xlu0.b32.cont [4/16] (narrow) %v1586_v48, 8  ;;  %v377_v33 = vmul.f32 %v1676_v57, %v1439_v19  ;;  %v480_v43 = vsub.f32 1.5, %v479_v42  ;;  %v1706_v61 = vsel %vm364_vm14, %v1625_v56, %v361_v44  ;;  %vm483_vm0 = vweird.f32 %v1644_v27 }
  0xf2   : > { %628 = vxpose.xlu2.b32.cont [9/16] (narrow) %v1596_v26, 8  ;;  %v488_v34 = vmul.f32 %v1672_v31, %v487_v18  ;;  %v370_v23 = vsub.f32 1.5, %v369_v63  ;;  %1095 = vrsqrt.f32 %v1695_v49  ;;  %vm484_vm1 = vmor %vm482_vm15, %vm483_vm0  ;;  %vm373_vm2 = vweird.f32 %v1647_v37 }
  0xf3   : > { %v378_v25 = vmul.f32 %v1676_v57, %v377_v33  ;;  %v481_v54 = vmul.f32 %v1644_v27, %v480_v43  ;;  %vm372_vm3 = vweird.f32 %v1441_v20  ;;  %v1722_v33 = vpop.xlane.xlu1 %228  ;;  %vm492_vm5 = vweird.f32 %v1639_v39 }
  0xf4   : > { %v1700_v50 = vpop.eup %1091  ;;  %v489_v51 = vmul.f32 0.5, %v488_v34  ;;  %v371_v56 = vmul.f32 %v1647_v37, %v370_v23  ;;  %vm374_vm4 = vmor %vm372_vm3, %vm373_vm2  ;;  %vm493_vm6 = vweird.f32 %v1672_v31  ;;  %1097 = vrsqrt.f32 %v1722_v33 }
  0xf5   : > { %v1709_v60 = vpop.eup %1093  ;;  %v497_v22 = vmul.f32 %v1700_v50, %v1667_v30  ;;  %v379_v42 = vmul.f32 0.5, %v378_v25  ;;  %v1725_v63 = vsel %vm484_vm1, %v1644_v27, %v481_v54  ;;  %vm494_vm7 = vmor %vm492_vm5, %vm493_vm6  ;;  %vm382_vm8 = vweird.f32 %v1439_v19  ;;  %v231_v54 = vpop.xlane.xlu2 %230 }
  0xf6   : > { %v387_v35 = vmul.f32 %v1709_v60, %v1457_v32  ;;  %v490_v18 = vsub.f32 1.5, %v489_v51  ;;  %v1731_v25 = vsel %vm374_vm4, %v1647_v37, %v371_v56  ;;  %vm383_vm9 = vweird.f32 %v1676_v57 }
  0xf7   : > { %v498_v29 = vmul.f32 %v1700_v50, %v497_v22  ;;  %v380_v43 = vsub.f32 1.5, %v379_v42  ;;  %vm384_vm10 = vmor %vm382_vm8, %vm383_vm9  ;;  %vm502_vm11 = vweird.f32 %v1667_v30  ;;  %vm503_vm12 = vweird.f32 %v1700_v50 }
  0xf8   : > { %v1096_v44 = vpop.eup %1095  ;;  %v388_v34 = vmul.f32 %v1709_v60, %v387_v35  ;;  %v491_v23 = vmul.f32 %v1672_v31, %v490_v18  ;;  %1099 = vrsqrt.f32 %v231_v54  ;;  %vm504_vm13 = vmor %vm502_vm11, %vm503_vm12  ;;  %vm392_vm14 = vweird.f32 %v1457_v32 }
  0xf9   : > { %656 = vxpose.xlu0.b32.cont [5/16] (narrow) %v1614_v21, 8  ;;  %v499_v20 = vmul.f32 0.5, %v498_v29  ;;  %v507_v27 = vmul.f32 %v1096_v44, %v1695_v49  ;;  %v381_v39 = vmul.f32 %v1676_v57, %v380_v43  ;;  %vm393_vm15 = vweird.f32 %v1709_v60 }
  0xfa   : > { %629 = vxpose.xlu2.b32.cont [10/16] (narrow) %v1622_v55, 8  ;;  %v389_v51 = vmul.f32 0.5, %v388_v34  ;;  %v1742_v42 = vsel %vm494_vm7, %v1672_v31, %v491_v23  ;;  %v1098_v35 = vpop.eup %1097  ;;  %vm394_vm0 = vmor %vm392_vm14, %vm393_vm15  ;;  %vm512_vm1 = vweird.f32 %v1695_v49  ;;  %vm513_vm2 = vweird.f32 %v1096_v44 }
  0xfb   : > { %v500_v37 = vsub.f32 1.5, %v499_v20  ;;  %v508_v22 = vmul.f32 %v1096_v44, %v507_v27  ;;  %v1747_v19 = vsel %vm384_vm10, %v1676_v57, %v381_v39  ;;  %v517_v29 = vmul.f32 %v1098_v35, %v1722_v33  ;;  %v233_v57 = vpop.xlane.xlu0 %232  ;;  %vm514_vm3 = vmor %vm512_vm1, %vm513_vm2 }
  0xfc   : > { %v390_v56 = vsub.f32 1.5, %v389_v51  ;;  %1101 = vrsqrt.f32 %v233_v57  ;;  %vm522_vm4 = vweird.f32 %v1722_v33  ;;  %vm523_vm5 = vweird.f32 %v1098_v35 }
  0xfd   : > { %v509_v18 = vmul.f32 0.5, %v508_v22  ;;  %v501_v31 = vmul.f32 %v1700_v50, %v500_v37  ;;  %v518_v34 = vmul.f32 %v1098_v35, %v517_v29  ;;  %v1765_v22 = vpop.xlane.xlu1 %234  ;;  %vm524_vm6 = vmor %vm522_vm4, %vm523_vm5  ;;  %vm532_vm7 = vweird.f32 %v231_v54 }
  0xfe   : > { %v391_v43 = vmul.f32 %v1709_v60, %v390_v56  ;;  %v1100_v27 = vpop.eup %1099  ;;  %1103 = vrsqrt.f32 %v1765_v22  ;;  %vm542_vm10 = vweird.f32 %v233_v57 }
  0xff   : > { %v510_v30 = vsub.f32 1.5, %v509_v18  ;;  %v1757_v20 = vsel %vm504_vm13, %v1700_v50, %v501_v31  ;;  %v519_v32 = vmul.f32 0.5, %v518_v34  ;;  %v527_v51 = vmul.f32 %v1100_v27, %v231_v54 }
 0x100   : > { %v1762_v23 = vsel %vm394_vm0, %v1709_v60, %v391_v43  ;;  %vm533_vm8 = vweird.f32 %v1100_v27  ;;  %v557_v54 = vsub.f32 0.0, %v1435_v16  ;;  %vm552_vm13 = vweird.f32 %v1765_v22 }
 0x101   : > { %657 = vxpose.xlu0.b32.cont [6/16] (narrow) %v1642_v41, 8  ;;  %v511_v39 = vmul.f32 %v1096_v44, %v510_v30  ;;  %v520_v37 = vsub.f32 1.5, %v519_v32  ;;  %v528_v50 = vmul.f32 %v1100_v27, %v527_v51  ;;  %vm534_vm9 = vmor %vm532_vm7, %vm533_vm8  ;;  %v556_v51 = vsub.f32 0.0, %v1424_v53 }
 0x102   : > { %630 = vxpose.xlu2.b32.cont [11/16] (narrow) %v1652_v58, 8  ;;  %v1102_v18 = vpop.eup %1101  ;;  %v589_v16 = vmul.f32 %v557_v54, %v1350_v5 }
 0x103   : > { %v1767_v56 = vsel %vm514_vm3, %v1096_v44, %v511_v39  ;;  %v537_v49 = vmul.f32 %v1102_v18, %v233_v57  ;;  %v529_v60 = vmul.f32 0.5, %v528_v50  ;;  %v521_v29 = vmul.f32 %v1098_v35, %v520_v37 }
 0x104   : > { %v1774_v34 = vpop.eup %1103  ;;  %v558_v39 = vsub.f32 0.0, %v1448_v28  ;;  %v560_v37 = vsub.f32 0.0, %v1483_v62  ;;  %vm543_vm11 = vweird.f32 %v1102_v18  ;;  %v559_v62 = vsub.f32 0.0, %v1461_v40 }
 0x105   : > { %v538_v31 = vmul.f32 %v1102_v18, %v537_v49  ;;  %v530_v43 = vsub.f32 1.5, %v529_v60  ;;  %v1772_v30 = vsel %vm524_vm6, %v1098_v35, %v521_v29  ;;  %v547_v33 = vmul.f32 %v1774_v34, %v1765_v22  ;;  %vm544_vm12 = vmor %vm542_vm10, %vm543_vm11 }
 0x106   : > { %v588_v60 = vmul.f32 %v556_v51, %v1338_v2  ;;  %v590_v29 = vmul.f32 %v558_v39, %v1335_v1  ;;  %v592_v53 = vmul.f32 %v560_v37, %v1332_v0  ;;  %v563_v57 = vsub.f32 0.0, %v1568_v45 }
 0x107   : > { %v539_v44 = vmul.f32 0.5, %v538_v31  ;;  %v531_v32 = vmul.f32 %v1100_v27, %v530_v43  ;;  %v548_v50 = vmul.f32 %v1774_v34, %v547_v33  ;;  %v561_v43 = vsub.f32 0.0, %v1511_v47 }
 0x108   : > { %v564_v2 = vsub.f32 0.0, %v1596_v26  ;;  %v565_v1 = vsub.f32 0.0, %v1622_v55  ;;  %v566_v0 = vsub.f32 0.0, %v1652_v58  ;;  %v567_v33 = vsub.f32 0.0, %v1680_v24 }
 0x109   : > { %658 = vxpose.xlu0.b32.cont [7/16] (narrow) %v1670_v52, 8  ;;  %v540_v35 = vsub.f32 1.5, %v539_v44  ;;  %v1783_v49 = vsel %vm534_vm9, %v1100_v27, %v531_v32  ;;  %v549_v28 = vmul.f32 0.5, %v548_v50  ;;  %v562_v27 = vsub.f32 0.0, %v1538_v15 }
 0x10a   : > { %631 = vxpose.xlu2.b32.cont [12/16] (narrow) %v1680_v24, 8  ;;  %v718_v44 = vlaneseq  ;;  %v568_v40 = vsub.f32 0.0, %v1706_v61  ;;  %v569_v47 = vsub.f32 0.0, %v1731_v25  ;;  %v570_v15 = vsub.f32 0.0, %v1747_v19 }
 0x10b   : > { %v541_v31 = vmul.f32 %v1102_v18, %v540_v35  ;;  %v571_v32 = vsub.f32 0.0, %v1762_v23  ;;  %v550_v51 = vsub.f32 1.5, %v549_v28  ;;  %v591_v45 = vmul.f32 %v559_v62, %v1347_v4 }
 0x10c   : > { %v593_v26 = vmul.f32 %v561_v43, %v1344_v3  ;;  %v594_v55 = vmul.f32 %v562_v27, %v1362_v8  ;;  %v1809_v58 = vshrl.u32 %v718_v44, 7  ;;  %v595_v24 = vmul.f32 %v563_v57, %v1359_v7 }
 0x10d   : > { %v1803_v5 = vsel %vm544_vm12, %v1102_v18, %v541_v31  ;;  %vm553_vm14 = vweird.f32 %v1774_v34  ;;  %v598_v4 = vmul.f32 %v566_v0, %v1371_v10  ;;  %v599_v3 = vmul.f32 %v567_v33, %v1368_v9 }
 0x10e   : > { %v600_v8 = vmul.f32 %v568_v40, %v1386_v14  ;;  %v551_v22 = vmul.f32 %v1774_v34, %v550_v51  ;;  %vm1829_vm15 = vmor %vm552_vm13, %vm553_vm14  ;;  %v1834_v9 = vadd.s32 8, %v1809_v58  ;;  %v1837_v10 = vadd.s32 16, %v1809_v58 }
 0x10f   : > { %v1844_v14 = vadd.s32 24, %v1809_v58  ;;  %v1850_v18 = vadd.s32 40, %v1809_v58  ;;  %v1853_v39 = vadd.s32 48, %v1809_v58  ;;  %v1856_v37 = vadd.s32 56, %v1809_v58 }
 0x110   : > { %v1862_v28 = vadd.s32 64, %v1809_v58  ;;  %v1865_v31 = vadd.s32 72, %v1809_v58  ;;  %v1871_v43 = vsel %vm1829_vm15, %v1774_v34, %v551_v22  ;;  %v1874_v27 = vadd.s32 80, %v1809_v58 }
 0x111   : > { %659 = vxpose.xlu0.b32.cont [8/16] (narrow) %v1698_v46, 8  ;;  %v1888_v57 = vadd.s32 112, %v1809_v58 }
 0x112   : > { %632 = vxpose.xlu2.b32.cont [13/16] (narrow) %v1706_v61, 8  ;;  %v596_v61 = vmul.f32 %v564_v2, %v1356_v6  ;;  %v1826_v6 = vmul.f32 %v571_v32, %v1394_v17  ;;  %v1847_v17 = vadd.s32 32, %v1809_v58 }
 0x119   : > { %660 = vxpose.xlu0.b32.cont [9/16] (narrow) %v1725_v63, 8 }
 0x11a   : > { %633 = vxpose.xlu2.b32.cont [14/16] (narrow) %v1731_v25, 8  ;;  %v597_v25 = vmul.f32 %v565_v1, %v1374_v11 }
 0x121   : > { %661 = vxpose.xlu0.b32.cont [10/16] (narrow) %v1742_v42, 8 }
 0x122   : > { %634 = vxpose.xlu2.b32.cont [15/16] (narrow) %v1747_v19, 8  ;;  %v1820_v19 = vmul.f32 %v569_v47, %v1383_v13  ;;  %v1839_v13 = vand.u32 127, %v718_v44 }
 0x124   : > { %vm737_vm0 = vcmp.eq.s32.totalorder %v1809_v58, %v1839_v13  ;;  %vm738_vm1 = vcmp.eq.s32.totalorder %v1834_v9, %v1839_v13  ;;  %vm739_vm2 = vcmp.eq.s32.totalorder %v1837_v10, %v1839_v13  ;;  %vm740_vm3 = vcmp.eq.s32.totalorder %v1844_v14, %v1839_v13 }
 0x125   : > { %vm741_vm4 = vcmp.eq.s32.totalorder %v1847_v17, %v1839_v13  ;;  %vm742_vm5 = vcmp.eq.s32.totalorder %v1850_v18, %v1839_v13  ;;  %vm743_vm6 = vcmp.eq.s32.totalorder %v1853_v39, %v1839_v13  ;;  %vm744_vm7 = vcmp.eq.s32.totalorder %v1856_v37, %v1839_v13 }
 0x126   : > { %vm745_vm8 = vcmp.eq.s32.totalorder %v1862_v28, %v1839_v13  ;;  %vm746_vm9 = vcmp.eq.s32.totalorder %v1865_v31, %v1839_v13  ;;  %vm747_vm10 = vcmp.eq.s32.totalorder %v1874_v27, %v1839_v13  ;;  %vm751_vm14 = vcmp.eq.s32.totalorder %v1888_v57, %v1839_v13 }
 0x129   : > { %662 = vxpose.xlu0.b32.cont [11/16] (narrow) %v1757_v20, 8 }
 0x12a   : > { %635 = vxpose.xlu2.b32.end [16/16] (narrow) %v1762_v23, 8  ;;  %v1823_v23 = vmul.f32 %v570_v15, %v1380_v12 }
 0x131   : > { %663 = vxpose.xlu0.b32.cont [12/16] (narrow) %v1767_v56, 8 }
 0x139   : > { %664 = vxpose.xlu0.b32.cont [13/16] (narrow) %v1772_v30, 8 }
 0x141   : > { %665 = vxpose.xlu0.b32.cont [14/16] (narrow) %v1783_v49, 8 }
 0x149   : > { %666 = vxpose.xlu0.b32.cont [15/16] (narrow) %v1803_v5, 8 }
 0x14b   : > { %v636_v7 = vpop.trf.xlu2 }
 0x14c   : > { %v1841_v12 = vperm.slane %v636_v7, 0 }
 0x14e   : > { %v686_v35 = vmul.f32 %v1841_v12, %v588_v60  ;;  %v687_v50 = vmul.f32 %v1841_v12, %v589_v16  ;;  %v688_v54 = vmul.f32 %v1841_v12, %v590_v29  ;;  %v689_v62 = vmul.f32 %v1841_v12, %v591_v45 }
 0x14f   : > { %v1877_v60 = vadd.s32 88, %v1809_v58  ;;  %v1880_v29 = vadd.s32 96, %v1809_v58  ;;  %v690_v44 = vmul.f32 %v1841_v12, %v592_v53  ;;  %v1885_v16 = vadd.s32 104, %v1809_v58 }
 0x150   : > { %v691_v34 = vmul.f32 %v1841_v12, %v593_v26  ;;  %v692_v2 = vmul.f32 %v1841_v12, %v594_v55  ;;  %v753_v1 = vadd.f32 1.0, %v686_v35  ;;  %v754_v0 = vadd.f32 1.0, %v687_v50 }
 0x151   : > { %667 = vxpose.xlu0.b32.end [16/16] (narrow) %v1871_v43, 8  ;;  %v755_v33 = vadd.f32 1.0, %v688_v54  ;;  %v693_v53 = vmul.f32 %v1841_v12, %v595_v24  ;;  %v756_v40 = vadd.f32 1.0, %v689_v62  ;;  %v694_v47 = vmul.f32 %v1841_v12, %v596_v61 }
 0x152   : > { %v757_v15 = vadd.f32 1.0, %v690_v44  ;;  %v695_v32 = vmul.f32 %v1841_v12, %v597_v25  ;;  %v696_v51 = vmul.f32 %v1841_v12, %v598_v4  ;;  %v758_v45 = vadd.f32 1.0, %v691_v34 }
 0x153   : > { %v759_v26 = vadd.f32 1.0, %v692_v2  ;;  %v817_v55 = vsel %vm737_vm0, %v753_v1, %v686_v35  ;;  %v818_v24 = vsel %vm738_vm1, %v754_v0, %v687_v50  ;;  %v819_v61 = vsel %vm739_vm2, %v755_v33, %v688_v54 }
 0x154   : > { %v697_v25 = vmul.f32 %v1841_v12, %v599_v3  ;;  %v760_v4 = vadd.f32 1.0, %v693_v53  ;;  %v820_v7 = vsel %vm740_vm3, %v756_v40, %v689_v62  ;;  %849 = vst [vmem:[%s1925_s17] sm:$0xff] %v817_v55  ;;  %v698_v22 = vmul.f32 %v1841_v12, %v600_v8 }
 0x155   : > { %v761_v11 = vadd.f32 1.0, %v694_v47  ;;  %v821_v3 = vsel %vm741_vm4, %v757_v15, %v690_v44  ;;  %850 = vst [vmem:[%s1925_s17 + $0x8] sm:$0xff] %v818_v24  ;;  %v699_v35 = vmul.f32 %v1841_v12, %v1820_v19  ;;  %v762_v50 = vadd.f32 1.0, %v695_v32 }
 0x156   : > { %v822_v54 = vsel %vm742_vm5, %v758_v45, %v691_v34  ;;  %851 = vst [vmem:[%s1925_s17 + $0x10] sm:$0xff] %v819_v61  ;;  %v700_v8 = vmul.f32 %v1841_v12, %v1823_v23  ;;  %v763_v62 = vadd.f32 1.0, %v696_v51  ;;  %v823_v44 = vsel %vm743_vm6, %v759_v26, %v692_v2 }
 0x157   : > { %852 = vst [vmem:[%s1925_s17 + $0x18] sm:$0xff] %v820_v7  ;;  %v701_v19 = vmul.f32 %v1841_v12, %v1826_v6  ;;  %v764_v34 = vadd.f32 1.0, %v697_v25  ;;  %v824_v1 = vsel %vm744_vm7, %v760_v4, %v693_v53  ;;  %v1960_v23 = vadd.s32 120, %v1809_v58  ;;  %v1105_v4 = vld [vmem:[%s1325_s24 + $0x80] sm:$0xff] }
 0x158   : > { %853 = vst [vmem:[%s1925_s17 + $0x20] sm:$0xff] %v821_v3  ;;  %vm748_vm11 = vcmp.eq.s32.totalorder %v1877_v60, %v1839_v13  ;;  %v765_v2 = vadd.f32 1.0, %v698_v22  ;;  %v825_v0 = vsel %vm745_vm8, %v761_v11, %v694_v47  ;;  %vm749_vm12 = vcmp.eq.s32.totalorder %v1880_v29, %v1839_v13 }
 0x159   : > { %854 = vst [vmem:[%s1925_s17 + $0x28] sm:$0xff] %v822_v54  ;;  %v766_v6 = vadd.f32 1.0, %v699_v35  ;;  %v826_v12 = vsel %vm746_vm9, %v762_v50, %v695_v32  ;;  %vm750_vm13 = vcmp.eq.s32.totalorder %v1885_v16, %v1839_v13  ;;  %v767_v33 = vadd.f32 1.0, %v700_v8  ;;  %v1107_v50 = vld [vmem:[%s1325_s24 + $0x90] sm:$0xff] }
 0x15a   : > { %855 = vst [vmem:[%s1925_s17 + $0x30] sm:$0xff] %v823_v44  ;;  %v827_v53 = vsel %vm747_vm10, %v763_v62, %v696_v51  ;;  %v768_v40 = vadd.f32 1.0, %v701_v19  ;;  %v828_v47 = vsel %vm748_vm11, %v764_v34, %v697_v25  ;;  %vm752_vm15 = vcmp.eq.s32.totalorder %v1960_v23, %v1839_v13  ;;  %v1109_v44 = vld [vmem:[%s1325_s24 + $0xa0] sm:$0xff] }
 0x15b   : > { %856 = vst [vmem:[%s1925_s17 + $0x38] sm:$0xff] %v824_v1  ;;  %v829_v15 = vsel %vm749_vm12, %v765_v2, %v698_v22  ;;  %v830_v32 = vsel %vm750_vm13, %v766_v6, %v699_v35  ;;  %v831_v51 = vsel %vm751_vm14, %v767_v33, %v700_v8  ;;  %v572_v26 = vsub.f32 0.0, %v1500_v38  ;;  %v1106_v22 = vld [vmem:[%s1325_s24 + $0x88] sm:$0xff] }
 0x15c   : > { %857 = vst [vmem:[%s1925_s17 + $0x40] sm:$0xff] %v825_v0  ;;  %v832_v45 = vsel %vm752_vm15, %v768_v40, %v701_v19  ;;  %v573_v55 = vsub.f32 0.0, %v1530_v59  ;;  %v574_v24 = vsub.f32 0.0, %v1560_v36  ;;  %v575_v61 = vsub.f32 0.0, %v1586_v48  ;;  %v1108_v48 = vld [vmem:[%s1325_s24 + $0x98] sm:$0xff]  ;;  %v1110_v1 = vld [vmem:[%s1325_s24 + $0xa8] sm:$0xff] }
 0x15d   : > { %858 = vst [vmem:[%s1925_s17 + $0x48] sm:$0xff] %v826_v12  ;;  %v576_v25 = vsub.f32 0.0, %v1614_v21  ;;  %v604_v7 = vmul.f32 %v1105_v4, %v572_v26  ;;  %v577_v3 = vsub.f32 0.0, %v1642_v41  ;;  %v578_v54 = vsub.f32 0.0, %v1670_v52  ;;  %v1113_v40 = vld [vmem:[%s1325_s24 + $0xc0] sm:$0xff] }
 0x15e   : > { %859 = vst [vmem:[%s1925_s17 + $0x50] sm:$0xff] %v827_v53  ;;  %v605_v11 = vmul.f32 %v1106_v22, %v573_v55  ;;  %v606_v38 = vmul.f32 %v1107_v50, %v574_v24  ;;  %v579_v59 = vsub.f32 0.0, %v1698_v46  ;;  %v607_v21 = vmul.f32 %v1108_v48, %v575_v61 }
 0x15f   : > { %860 = vst [vmem:[%s1925_s17 + $0x58] sm:$0xff] %v828_v47  ;;  %v580_v8 = vsub.f32 0.0, %v1725_v63  ;;  %v581_v62 = vsub.f32 0.0, %v1742_v42  ;;  %v582_v41 = vsub.f32 0.0, %v1757_v20  ;;  %v608_v19 = vmul.f32 %v1109_v44, %v576_v25  ;;  %v1111_v42 = vld [vmem:[%s1325_s24 + $0xb0] sm:$0xff]  ;;  %v1112_v20 = vld [vmem:[%s1325_s24 + $0xb8] sm:$0xff] }
 0x160   : > { %861 = vst [vmem:[%s1925_s17 + $0x60] sm:$0xff] %v829_v15  ;;  %v609_v2 = vmul.f32 %v1110_v1, %v577_v3  ;;  %v583_v0 = vsub.f32 0.0, %v1767_v56  ;;  %v610_v6 = vmul.f32 %v1111_v42, %v578_v54  ;;  %v611_v12 = vmul.f32 %v1112_v20, %v579_v59  ;;  %v1114_v15 = vld [vmem:[%s1325_s24 + $0xc8] sm:$0xff]  ;;  %v1116_v25 = vld [vmem:[%s1325_s24 + $0xd8] sm:$0xff] }
 0x161   : > { %862 = vst [vmem:[%s1925_s17 + $0x68] sm:$0xff] %v830_v32  ;;  %v584_v33 = vsub.f32 0.0, %v1772_v30  ;;  %v612_v47 = vmul.f32 %v1113_v40, %v580_v8  ;;  %v613_v32 = vmul.f32 %v1114_v15, %v581_v62  ;;  %v585_v30 = vsub.f32 0.0, %v1783_v49  ;;  %v1118_v62 = vld [vmem:[%s1325_s24 + $0xe8] sm:$0xff] }
 0x162   : > { %863 = vst [vmem:[%s1925_s17 + $0x70] sm:$0xff] %v831_v51  ;;  %v1115_v51 = vld [vmem:[%s1325_s24 + $0xd0] sm:$0xff]  ;;  %v615_v4 = vmul.f32 %v1116_v25, %v583_v0  ;;  %v587_v54 = vsub.f32 0.0, %v1871_v43 }
 0x163   : > { %864 = vst [vmem:[%s1925_s17 + $0x78] sm:$0xff] %v832_v45  ;;  %v614_v45 = vmul.f32 %v1115_v51, %v582_v41  ;;  %v617_v41 = vmul.f32 %v1118_v62, %v585_v30 }
 0x17d   : > { %v668_v35 = vpop.trf.xlu0 }
 0x17e   : > { %v2018_v36 = vperm.slane %v668_v35, 0  ;;  %v586_v35 = vsub.f32 0.0, %v1803_v5 }
 0x180   : > { %v702_v52 = vmul.f32 %v2018_v36, %v604_v7  ;;  %v703_v46 = vmul.f32 %v2018_v36, %v605_v11  ;;  %v704_v34 = vmul.f32 %v2018_v36, %v606_v38  ;;  %v705_v63 = vmul.f32 %v2018_v36, %v607_v21  ;;  %v1117_v11 = vld [vmem:[%s1325_s24 + $0xe0] sm:$0xff] }
 0x181   : > { %v706_v53 = vmul.f32 %v2018_v36, %v608_v19  ;;  %v707_v56 = vmul.f32 %v2018_v36, %v609_v2  ;;  %v708_v26 = vmul.f32 %v2018_v36, %v610_v6  ;;  %v709_v7 = vmul.f32 %v2018_v36, %v611_v12 }
 0x182   : > { %v769_v55 = vadd.f32 1.0, %v702_v52  ;;  %v770_v24 = vadd.f32 1.0, %v703_v46  ;;  %v771_v61 = vadd.f32 1.0, %v704_v34  ;;  %v772_v22 = vadd.f32 1.0, %v705_v63 }
 0x183   : > { %v616_v3 = vmul.f32 %v1117_v11, %v584_v33  ;;  %v710_v50 = vmul.f32 %v2018_v36, %v612_v47  ;;  %v773_v38 = vadd.f32 1.0, %v706_v53  ;;  %v711_v59 = vmul.f32 %v2018_v36, %v613_v32 }
 0x184   : > { %v712_v48 = vmul.f32 %v2018_v36, %v614_v45  ;;  %v774_v49 = vadd.f32 1.0, %v707_v56  ;;  %v775_v21 = vadd.f32 1.0, %v708_v26  ;;  %v833_v8 = vsel %vm737_vm0, %v769_v55, %v702_v52  ;;  %v1119_v52 = vld [vmem:[%s1325_s24 + $0xf0] sm:$0xff] }
 0x185   : > { %v834_v5 = vsel %vm738_vm1, %v770_v24, %v703_v46  ;;  %v835_v43 = vsel %vm739_vm2, %v771_v61, %v704_v34  ;;  %v713_v44 = vmul.f32 %v2018_v36, %v615_v4  ;;  %v776_v19 = vadd.f32 1.0, %v709_v7  ;;  %865 = vst [vmem:[%s1925_s17 + $0x80] sm:$0xff] %v833_v8  ;;  %v1120_v34 = vld [vmem:[%s1325_s24 + $0xf8] sm:$0xff] }
 0x186   : > { %v836_v58 = vsel %vm740_vm3, %v772_v22, %v705_v63  ;;  %v618_v9 = vmul.f32 %v1119_v52, %v586_v35  ;;  %v714_v46 = vmul.f32 %v2018_v36, %v616_v3  ;;  %v777_v1 = vadd.f32 1.0, %v710_v50  ;;  %866 = vst [vmem:[%s1925_s17 + $0x88] sm:$0xff] %v834_v5 }
 0x187   : > { %v837_v10 = vsel %vm741_vm4, %v773_v38, %v706_v53  ;;  %v619_v2 = vmul.f32 %v1120_v34, %v587_v54  ;;  %v715_v14 = vmul.f32 %v2018_v36, %v617_v41  ;;  %v778_v0 = vadd.f32 1.0, %v711_v59  ;;  %867 = vst [vmem:[%s1925_s17 + $0x90] sm:$0xff] %v835_v43 }
 0x188   : > { %v838_v63 = vsel %vm742_vm5, %v774_v49, %v707_v56  ;;  %v716_v42 = vmul.f32 %v2018_v36, %v618_v9  ;;  %v779_v6 = vadd.f32 1.0, %v712_v48  ;;  %v839_v17 = vsel %vm743_vm6, %v775_v21, %v708_v26  ;;  %868 = vst [vmem:[%s1925_s17 + $0x98] sm:$0xff] %v836_v58 }
 0x189   : > { %v717_v20 = vmul.f32 %v2018_v36, %v619_v2  ;;  %v780_v12 = vadd.f32 1.0, %v713_v44  ;;  %v840_v18 = vsel %vm744_vm7, %v776_v19, %v709_v7  ;;  %869 = vst [vmem:[%s1925_s17 + $0xa0] sm:$0xff] %v837_v10  ;;  %v781_v33 = vadd.f32 1.0, %v714_v46 }
 0x18a   : > { %v841_v39 = vsel %vm745_vm8, %v777_v1, %v710_v50  ;;  %870 = vst [vmem:[%s1925_s17 + $0xa8] sm:$0xff] %v838_v63  ;;  %v782_v53 = vadd.f32 1.0, %v715_v14  ;;  %v842_v36 = vsel %vm746_vm9, %v778_v0, %v711_v59  ;;  %v783_v37 = vadd.f32 1.0, %v716_v42 }
 0x18b   : > { %871 = vst [vmem:[%s1925_s17 + $0xb0] sm:$0xff] %v839_v17  ;;  %v843_v28 = vsel %vm747_vm10, %v779_v6, %v712_v48  ;;  %v784_v40 = vadd.f32 1.0, %v717_v20  ;;  %v844_v31 = vsel %vm748_vm11, %v780_v12, %v713_v44  ;;  %v845_v47 = vsel %vm749_vm12, %v781_v33, %v714_v46 }
 0x18c   : > { %872 = vst [vmem:[%s1925_s17 + $0xb8] sm:$0xff] %v840_v18  ;;  %v846_v27 = vsel %vm750_vm13, %v782_v53, %v715_v14  ;;  %v847_v60 = vsel %vm751_vm14, %v783_v37, %v716_v42 }
 0x18d   : > { %873 = vst [vmem:[%s1925_s17 + $0xc0] sm:$0xff] %v841_v39  ;;  %v848_v29 = vsel %vm752_vm15, %v784_v40, %v717_v20 }
 0x18e   : > { %874 = vst [vmem:[%s1925_s17 + $0xc8] sm:$0xff] %v842_v36 }
 0x18f   : > { %875 = vst [vmem:[%s1925_s17 + $0xd0] sm:$0xff] %v843_v28 }
 0x190   : > { %876 = vst [vmem:[%s1925_s17 + $0xd8] sm:$0xff] %v844_v31 }
 0x191   : > { %877 = vst [vmem:[%s1925_s17 + $0xe0] sm:$0xff] %v845_v47 }
 0x192   : > { %878 = vst [vmem:[%s1925_s17 + $0xe8] sm:$0xff] %v846_v27 }
 0x193   : > { %879 = vst [vmem:[%s1925_s17 + $0xf0] sm:$0xff] %v847_v60 }
 0x194   : > { %880 = vst [vmem:[%s1925_s17 + $0xf8] sm:$0xff] %v848_v29 }
 0x195   : > { %1178 = shalt.err (!%p1175_p4)
}
 0x196   : > { %s1221_s16 = smov 128   ;;  %s1222_s20 = smov 8  }
 0x197   : > { %993 = dma.vmem_to_hbm [thread:$0]  (%p1283_p11), %s896_s28, 4096, %s898_s29, %s882_s30, %s1221_s16, %s1221_s16, %s1222_s20  }
 0x198 PF: > { %s912_s21 = sand.u32 1, %s1205_s6   ;;  %p2164_p7 = scmp.ge.s32.totalorder %s1217_s9, 2 }
 0x199   : > { %s913_s22 = scalar_lea.sflag [#allocation4], %s912_s21 }
 0x19a   : > { %p1000_p5 = pnand %p2164_p7, %p1287_p12 }
 0x19c   : > { %p1001_p8 = pneg %p1000_p5 }
 0x19e   : > { %1200 = dma.done.wait (%p1001_p8), %s913_s22, 4096  }
 0x19f   : > { %1202 = vsyncadd (%p1001_p8), %s913_s22, 4294963200  ;;  %p14_p10 = scmp.ge.s32.totalorder %s1258_s12, 4   ;;  %s2165_s6 = smov %s1209_s7 }
 0x1a0   : > { %s2166_s7 = smov %s1213_s8  ;;  %s2167_s8 = smov %s1270_s15 }
 0x1a1   : > { %s2168_s9 = smov %s1258_s12  ;;  %16 = sbr.rel (!%p14_p10) target bundleno = 5 (0x5), region = 69 }
 0x1a6   :  { %919 = vsyncpa [#allocation3], 1 }
 0x1a7   :  { %921 = vsyncpa [#allocation3 + $0x1], 1 }
 0x1a8   :  { %922 = vsyncpa [#allocation4], 1 }
 0x1a9   :  { %924 = vsyncpa [#allocation4 + $0x1], 1 }

</bundles_post_ra>
